<compile_context>
chip_gen: v7x
topology: tpu7x:2x2x1
jax: 0.10.0
libtpu: 0.0.40
codegen_flags: <defaults>
</compile_context>

<pallas_src>
import math
import functools

import jax
import jax.numpy as jnp
from jax.experimental import pallas as pl
from jax.experimental.pallas import tpu as pltpu


LANE = 128  # TPU lane width: channel dims padded to a multiple of this

# Generation-aware VMEM budget (v5e/v6e: 128 MiB, v7x: 64 MiB per core).
try:
    _VMEM_PHYS = int(pltpu.get_tpu_info().vmem_capacity_bytes)
except Exception:  # noqa: BLE001 - fall back to the most conservative generation
    _VMEM_PHYS = 64 << 20
_VMEM_LIMIT = min(int(_VMEM_PHYS * 0.75), 96 << 20)
# Resident-A fused path: A_hat (bf16) must fit comfortably in VMEM.
_FUSED_MAX_NPAD = 4096 if _VMEM_PHYS >= (100 << 20) else 2048


# ----------------------------- Pallas kernels -------------------------------


def _fused_gcn_kernel(a_ref, x_ref, pw_ref, pb_ref, cw_ref, cb_ref, ow_ref, ob_ref,
                      o_ref, *, num_layers):
    """Whole network in one kernel: A_hat and all weights resident in VMEM."""
    a = a_ref[...]                                                     # bf16, read once
    # proj Linear
    h = jnp.dot(x_ref[...], pw_ref[...],
                preferred_element_type=jnp.float32) + pb_ref[...]
    # GCNConv layers: relu((A_hat @ h) @ W_l^T + b_l)
    for layer in range(num_layers):
        ah = jnp.dot(a, h.astype(jnp.bfloat16),
                     preferred_element_type=jnp.float32)
        h = jnp.maximum(
            jnp.dot(ah.astype(jnp.bfloat16), cw_ref[layer],
                    preferred_element_type=jnp.float32) + cb_ref[layer], 0.0)
        # TODO(synk): F.dropout between layers is training-only; omitted (eval mode).
    # out Linear
    o_ref[...] = (jnp.dot(h.astype(jnp.bfloat16), ow_ref[...],
                          preferred_element_type=jnp.float32)
                  + ob_ref[...]).astype(o_ref.dtype)


def _linear_kernel(x_ref, w_ref, b_ref, o_ref):
    # y = x @ W_t + b   (W_t pre-transposed to [in, out]); bf16 x bf16 -> f32 acc.
    y = jnp.dot(x_ref[...], w_ref[...],
                preferred_element_type=jnp.float32) + b_ref[...]
    o_ref[...] = y.astype(o_ref.dtype)


def _gcn_conv_kernel(a_ref, h_ref, w_ref, b_ref, o_ref, acc_ref):
    # Accumulate A_hat @ H over the source-node axis, then weight / bias / ReLU.
    k = pl.program_id(1)

    @pl.when(k == 0)
    def _():
        acc_ref[...] = jnp.zeros_like(acc_ref)

    acc_ref[...] += jnp.dot(a_ref[...], h_ref[...],
                            preferred_element_type=jnp.float32)

    @pl.when(k == pl.num_programs(1) - 1)
    def _():
        y = jnp.dot(acc_ref[...].astype(jnp.bfloat16), w_ref[...],
                    preferred_element_type=jnp.float32) + b_ref[...]
        o_ref[...] = jnp.maximum(y, 0.0).astype(o_ref.dtype)


def _gcn_conv_out_kernel(a_ref, h_ref, w_ref, b_ref, w2_ref, b2_ref, o_ref, acc_ref):
    # Last conv layer with the output Linear fused into the finalize branch.
    k = pl.program_id(1)

    @pl.when(k == 0)
    def _():
        acc_ref[...] = jnp.zeros_like(acc_ref)

    acc_ref[...] += jnp.dot(a_ref[...], h_ref[...],
                            preferred_element_type=jnp.float32)

    @pl.when(k == pl.num_programs(1) - 1)
    def _():
        y = jnp.dot(acc_ref[...].astype(jnp.bfloat16), w_ref[...],
                    preferred_element_type=jnp.float32) + b_ref[...]
        y = jnp.maximum(y, 0.0)
        out = jnp.dot(y.astype(jnp.bfloat16), w2_ref[...],
                      preferred_element_type=jnp.float32) + b2_ref[...]
        o_ref[...] = out.astype(o_ref.dtype)


# ------------------------------ wrappers -------------------------------------


def fused_gcn(a_pad, x_pad, params, *, num_layers):
    n_pad = a_pad.shape[0]
    out_p = params["out_w_t"].shape[1]
    vspec = pl.BlockSpec(memory_space=pltpu.MemorySpace.VMEM)
    return pl.pallas_call(
        functools.partial(_fused_gcn_kernel, num_layers=num_layers),
        out_shape=jax.ShapeDtypeStruct((n_pad, out_p), jnp.float32),
        in_specs=[vspec] * 8,
        out_specs=vspec,
        compiler_params=pltpu.CompilerParams(vmem_limit_bytes=_VMEM_LIMIT),
    )(a_pad, x_pad,
      params["proj_w_t"], params["proj_b"],
      params["conv_w_t"], params["conv_b"],
      params["out_w_t"], params["out_b"])


def linear(x, w_t, b, row_tile, out_dtype):
    """nn.Linear: y = x @ W^T + b, tiled over rows (weights stay resident)."""
    n_rows, cin = x.shape
    cout = w_t.shape[1]
    return pl.pallas_call(
        _linear_kernel,
        out_shape=jax.ShapeDtypeStruct((n_rows, cout), out_dtype),
        grid=(n_rows // row_tile,),
        in_specs=[
            pl.BlockSpec((row_tile, cin), lambda i: (i, 0)),
            pl.BlockSpec((cin, cout), lambda i: (0, 0)),
            pl.BlockSpec((1, cout), lambda i: (0, 0)),
        ],
        out_specs=pl.BlockSpec((row_tile, cout), lambda i: (i, 0)),
        compiler_params=pltpu.CompilerParams(
            dimension_semantics=("parallel",), vmem_limit_bytes=_VMEM_LIMIT),
    )(x, w_t, b)


def gcn_conv(a_hat, h, w_t, b, rt, kt):
    """relu((A_hat @ h) @ W^T + b), rectangular (rt x kt) A tiles, f32 accumulator."""
    n_pad = a_hat.shape[0]
    hid_p = h.shape[1]
    return pl.pallas_call(
        _gcn_conv_kernel,
        out_shape=jax.ShapeDtypeStruct((n_pad, hid_p), jnp.bfloat16),
        grid=(n_pad // rt, n_pad // kt),
        in_specs=[
            pl.BlockSpec((rt, kt), lambda i, k: (i, k)),       # A_hat tile (bf16)
            pl.BlockSpec((kt, hid_p), lambda i, k: (k, 0)),    # H source-node tile
            pl.BlockSpec((hid_p, hid_p), lambda i, k: (0, 0)),  # conv weight, resident
            pl.BlockSpec((1, hid_p), lambda i, k: (0, 0)),      # conv bias, resident
        ],
        out_specs=pl.BlockSpec((rt, hid_p), lambda i, k: (i, 0)),
        scratch_shapes=[pltpu.VMEM((rt, hid_p), jnp.float32)],
        compiler_params=pltpu.CompilerParams(
            dimension_semantics=("parallel", "arbitrary"),
            vmem_limit_bytes=_VMEM_LIMIT),
    )(a_hat, h, w_t, b)


def gcn_conv_out(a_hat, h, w_t, b, w2_t, b2, rt, kt):
    """Last conv layer with the output Linear fused into the finalize."""
    n_pad = a_hat.shape[0]
    hid_p = h.shape[1]
    out_p = w2_t.shape[1]
    return pl.pallas_call(
        _gcn_conv_out_kernel,
        out_shape=jax.ShapeDtypeStruct((n_pad, out_p), jnp.float32),
        grid=(n_pad // rt, n_pad // kt),
        in_specs=[
            pl.BlockSpec((rt, kt), lambda i, k: (i, k)),
            pl.BlockSpec((kt, hid_p), lambda i, k: (k, 0)),
            pl.BlockSpec((hid_p, hid_p), lambda i, k: (0, 0)),
            pl.BlockSpec((1, hid_p), lambda i, k: (0, 0)),
            pl.BlockSpec((hid_p, out_p), lambda i, k: (0, 0)),
            pl.BlockSpec((1, out_p), lambda i, k: (0, 0)),
        ],
        out_specs=pl.BlockSpec((rt, out_p), lambda i, k: (i, 0)),
        scratch_shapes=[pltpu.VMEM((rt, hid_p), jnp.float32)],
        compiler_params=pltpu.CompilerParams(
            dimension_semantics=("parallel", "arbitrary"),
            vmem_limit_bytes=_VMEM_LIMIT),
    )(a_hat, h, w_t, b, w2_t, b2)


# ------------------------------ glue (plain JAX) -----------------------------


def _round_up(x, m):
    return ((x + m - 1) // m) * m


def _pad2(a, rows, cols):
    return jnp.zeros((rows, cols), a.dtype).at[: a.shape[0], : a.shape[1]].set(a)


def build_a_hat_padded(edge_index, n, n_pad):
    """A_hat = D^{-1/2} (A + I_remaining) D^{-1/2}, built directly into the padded
    (n_pad, n_pad) buffer and cast once to bf16. A[dst, src] = edge multiplicity so
    A_hat @ X aggregates source messages into targets (PyG source_to_target); self
    loops are only added to real nodes that do not already have one."""
    src, dst = edge_index[0], edge_index[1]
    a = jnp.zeros((n_pad, n_pad), jnp.float32).at[dst, src].add(1.0)
    diag = jnp.diagonal(a)
    real = jnp.arange(n_pad) < n
    a = a + jnp.diag(jnp.where(real & (diag == 0.0), 1.0, 0.0))
    deg = a.sum(axis=1)
    dinv = jnp.where(deg > 0.0, jax.lax.rsqrt(deg), 0.0)
    return (dinv[:, None] * a * dinv[None, :]).astype(jnp.bfloat16)


def init_params(key, in_c, hid_c, out_c, num_layers):
    in_p, hid_p, out_p = (_round_up(c, LANE) for c in (in_c, hid_c, out_c))
    keys = jax.random.split(key, 4 + max(num_layers, 1))

    def uniform(k, shape, bound):
        return jax.random.uniform(k, shape, jnp.float32, -bound, bound)

    bp = 1.0 / math.sqrt(in_c)
    bo = 1.0 / math.sqrt(hid_c)
    glorot = math.sqrt(6.0 / (hid_c + hid_c))

    if num_layers > 0:
        conv_w = jnp.stack([
            _pad2(uniform(keys[4 + i], (hid_c, hid_c), glorot), hid_p, hid_p)
            for i in range(num_layers)
        ])
    else:
        conv_w = jnp.zeros((1, hid_p, hid_p), jnp.float32)

    return {
        # nn.Linear weights pre-transposed to [in, out], zero-padded to 128 lanes, bf16
        "proj_w_t": _pad2(uniform(keys[0], (in_c, hid_c), bp), in_p, hid_p).astype(jnp.bfloat16),
        "proj_b": _pad2(uniform(keys[1], (1, hid_c), bp), 1, hid_p),            # f32
        "out_w_t": _pad2(uniform(keys[2], (hid_c, out_c), bo), hid_p, out_p).astype(jnp.bfloat16),
        "out_b": _pad2(uniform(keys[3], (1, out_c), bo), 1, out_p),              # f32
        # GCNConv: glorot weight (used as H @ W_t), bias zeros (PyG default)
        "conv_w_t": conv_w.astype(jnp.bfloat16),
        "conv_b": jnp.zeros((max(num_layers, 1), 1, hid_p), jnp.float32),
    }


def gcn_forward(x, edge_index, params, *, num_layers, out_c):
    n, in_c = x.shape
    in_p = params["proj_w_t"].shape[0]

    # ---- small/medium-N fast path: everything resident in VMEM, one kernel ----
    if n <= _FUSED_MAX_NPAD:
        n_pad = _round_up(max(n, LANE), LANE)
        a_pad = build_a_hat_padded(edge_index, n, n_pad)
        x_pad = jnp.zeros((n_pad, in_p), jnp.bfloat16).at[:n, :in_c].set(
            x.astype(jnp.bfloat16))
        out = fused_gcn(a_pad, x_pad, params, num_layers=num_layers)
        return out[:n, :out_c]

    # ---- large-N streamed path: tiled A stream, rectangular (rt, kt) tiles ----
    rt = 2048 if n > 8192 else 1024
    kt = 512
    n_pad = _round_up(n, rt)  # rt is a multiple of kt
    a_pad = build_a_hat_padded(edge_index, n, n_pad)
    x_pad = jnp.zeros((n_pad, in_p), jnp.bfloat16).at[:n, :in_c].set(
        x.astype(jnp.bfloat16))

    h = linear(x_pad, params["proj_w_t"], params["proj_b"], rt, jnp.bfloat16)
    if num_layers == 0:
        out = linear(h, params["out_w_t"], params["out_b"], rt, jnp.float32)
        return out[:n, :out_c]
    for layer in range(num_layers - 1):
        h = gcn_conv(a_pad, h, params["conv_w_t"][layer], params["conv_b"][layer],
                     rt, kt)
        # TODO(synk): dropout intentionally skipped (eval-mode forward)
    out = gcn_conv_out(a_pad, h,
                       params["conv_w_t"][num_layers - 1],
                       params["conv_b"][num_layers - 1],
                       params["out_w_t"], params["out_b"], rt, kt)
    return out[:n, :out_c]


# ----------------------------------- main ------------------------------------

if __name__ == "__main__":
    key = jax.random.PRNGKey(0)
    k_x, k_e1, k_e2, k_p = jax.random.split(key, 4)

    N, E = 32, 64                     # nodes, directed edges
    in_c, hid_c, out_c = 16, 32, 8
    num_layers = 3

    x = jax.random.normal(k_x, (N, in_c), jnp.float32)
    src = jax.random.randint(k_e1, (E,), 0, N)
    dst = jax.random.randint(k_e2, (E,), 0, N)
    edge_index = jnp.stack([src, dst], axis=0)    # [2, E] int32

    params = init_params(k_p, in_c, hid_c, out_c, num_layers)

    fwd = jax.jit(functools.partial(gcn_forward, num_layers=num_layers, out_c=out_c))
    out = fwd(x, edge_index, params)
    jax.block_until_ready(out)
    assert out.shape == (N, out_c)
    print("KERNEL_OK")
</pallas_src>

<mosaic_0001>
module attributes {stable_mosaic.version = 11 : i64} {
  func.func private @main(%arg0: i32) attributes {dimension_semantics = [#tpu.dimension_semantics<core_parallel>], iteration_bounds = array<i64: 2>, tpu.core_type = #tpu.core_type<sc_scalar_subcore>, window_params = []} {
    return
  }
}

module attributes {stable_mosaic.version = 11 : i64} {
  func.func private @main(%arg0: i32) attributes {dimension_semantics = [#tpu.dimension_semantics<core_parallel>], iteration_bounds = array<i64: 2>, tpu.core_type = #tpu.core_type<sc_scalar_subcore>, window_params = []} {
    return
  }
}

module attributes {stable_mosaic.version = 11 : i64} {
  func.func @_fused_gcn_kernel(%arg0: memref<128x128xbf16, #tpu.memory_space<vmem>>, %arg1: memref<128x128xbf16, #tpu.memory_space<vmem>>, %arg2: memref<128x128xbf16, #tpu.memory_space<vmem>>, %arg3: memref<1x128xf32, #tpu.memory_space<vmem>>, %arg4: memref<3x128x128xbf16, #tpu.memory_space<vmem>>, %arg5: memref<3x1x128xf32, #tpu.memory_space<vmem>>, %arg6: memref<128x128xbf16, #tpu.memory_space<vmem>>, %arg7: memref<1x128xf32, #tpu.memory_space<vmem>>, %arg8: memref<128x128xf32, #tpu.memory_space<vmem>>) attributes {dimension_semantics = [], scalar_prefetch = 0 : i64, scratch_operands = 0 : i64, tpu.core_type = #tpu.core_type<tc>} {
    %c0 = arith.constant 0 : index
    %c0_0 = arith.constant 0 : index
    %0 = vector.load %arg0[%c0, %c0_0] : memref<128x128xbf16, #tpu.memory_space<vmem>>, vector<128x128xbf16>
    %c0_1 = arith.constant 0 : index
    %c0_2 = arith.constant 0 : index
    %1 = vector.load %arg1[%c0_1, %c0_2] : memref<128x128xbf16, #tpu.memory_space<vmem>>, vector<128x128xbf16>
    %c0_3 = arith.constant 0 : index
    %c0_4 = arith.constant 0 : index
    %2 = vector.load %arg2[%c0_3, %c0_4] : memref<128x128xbf16, #tpu.memory_space<vmem>>, vector<128x128xbf16>
    %cst = arith.constant dense<0.000000e+00> : vector<128x128xf32>
    %3 = tpu.matmul %1, %2, %cst {dimension_numbers = #tpu.dot_dimension_numbers<[1], [0], [0], [1], [0, 0, 1, 1], [], []>} : vector<128x128xbf16>, vector<128x128xbf16>, vector<128x128xf32> -> vector<128x128xf32>
    %c0_5 = arith.constant 0 : index
    %c0_6 = arith.constant 0 : index
    %4 = vector.load %arg3[%c0_5, %c0_6] : memref<1x128xf32, #tpu.memory_space<vmem>>, vector<1x128xf32>
    %5 = vector.broadcast %4 : vector<1x128xf32> to vector<128x128xf32>
    %6 = arith.addf %3, %5 : vector<128x128xf32>
    %7 = arith.truncf %6 : vector<128x128xf32> to vector<128x128xbf16>
    %cst_7 = arith.constant dense<0.000000e+00> : vector<128x128xf32>
    %8 = tpu.matmul %0, %7, %cst_7 {dimension_numbers = #tpu.dot_dimension_numbers<[1], [0], [0], [1], [0, 0, 1, 1], [], []>} : vector<128x128xbf16>, vector<128x128xbf16>, vector<128x128xf32> -> vector<128x128xf32>
    %9 = arith.truncf %8 : vector<128x128xf32> to vector<128x128xbf16>
    %c0_8 = arith.constant 0 : index
    %c0_9 = arith.constant 0 : index
    %c0_10 = arith.constant 0 : index
    %10 = vector.load %arg4[%c0_8, %c0_9, %c0_10] : memref<3x128x128xbf16, #tpu.memory_space<vmem>>, vector<1x128x128xbf16>
    %11 = vector.shape_cast %10 : vector<1x128x128xbf16> to vector<128x128xbf16>
    %cst_11 = arith.constant dense<0.000000e+00> : vector<128x128xf32>
    %12 = tpu.matmul %9, %11, %cst_11 {dimension_numbers = #tpu.dot_dimension_numbers<[1], [0], [0], [1], [0, 0, 1, 1], [], []>} : vector<128x128xbf16>, vector<128x128xbf16>, vector<128x128xf32> -> vector<128x128xf32>
    %c0_12 = arith.constant 0 : index
    %c0_13 = arith.constant 0 : index
    %c0_14 = arith.constant 0 : index
    %13 = vector.load %arg5[%c0_12, %c0_13, %c0_14] : memref<3x1x128xf32, #tpu.memory_space<vmem>>, vector<1x1x128xf32>
    %14 = vector.shape_cast %13 : vector<1x1x128xf32> to vector<1x128xf32>
    %15 = vector.broadcast %14 : vector<1x128xf32> to vector<128x128xf32>
    %16 = arith.addf %12, %15 : vector<128x128xf32>
    %cst_15 = arith.constant 0.000000e+00 : f32
    %17 = vector.broadcast %cst_15 : f32 to vector<128x128xf32>
    %18 = arith.maximumf %16, %17 : vector<128x128xf32>
    %19 = arith.truncf %18 : vector<128x128xf32> to vector<128x128xbf16>
    %cst_16 = arith.constant dense<0.000000e+00> : vector<128x128xf32>
    %20 = tpu.matmul %0, %19, %cst_16 {dimension_numbers = #tpu.dot_dimension_numbers<[1], [0], [0], [1], [0, 0, 1, 1], [], []>} : vector<128x128xbf16>, vector<128x128xbf16>, vector<128x128xf32> -> vector<128x128xf32>
    %21 = arith.truncf %20 : vector<128x128xf32> to vector<128x128xbf16>
    %c1 = arith.constant 1 : index
    %c0_17 = arith.constant 0 : index
    %c0_18 = arith.constant 0 : index
    %22 = vector.load %arg4[%c1, %c0_17, %c0_18] : memref<3x128x128xbf16, #tpu.memory_space<vmem>>, vector<1x128x128xbf16>
    %23 = vector.shape_cast %22 : vector<1x128x128xbf16> to vector<128x128xbf16>
    %cst_19 = arith.constant dense<0.000000e+00> : vector<128x128xf32>
    %24 = tpu.matmul %21, %23, %cst_19 {dimension_numbers = #tpu.dot_dimension_numbers<[1], [0], [0], [1], [0, 0, 1, 1], [], []>} : vector<128x128xbf16>, vector<128x128xbf16>, vector<128x128xf32> -> vector<128x128xf32>
    %c1_20 = arith.constant 1 : index
    %c0_21 = arith.constant 0 : index
    %c0_22 = arith.constant 0 : index
    %25 = vector.load %arg5[%c1_20, %c0_21, %c0_22] : memref<3x1x128xf32, #tpu.memory_space<vmem>>, vector<1x1x128xf32>
    %26 = vector.shape_cast %25 : vector<1x1x128xf32> to vector<1x128xf32>
    %27 = vector.broadcast %26 : vector<1x128xf32> to vector<128x128xf32>
    %28 = arith.addf %24, %27 : vector<128x128xf32>
    %cst_23 = arith.constant 0.000000e+00 : f32
    %29 = vector.broadcast %cst_23 : f32 to vector<128x128xf32>
    %30 = arith.maximumf %28, %29 : vector<128x128xf32>
    %31 = arith.truncf %30 : vector<128x128xf32> to vector<128x128xbf16>
    %cst_24 = arith.constant dense<0.000000e+00> : vector<128x128xf32>
    %32 = tpu.matmul %0, %31, %cst_24 {dimension_numbers = #tpu.dot_dimension_numbers<[1], [0], [0], [1], [0, 0, 1, 1], [], []>} : vector<128x128xbf16>, vector<128x128xbf16>, vector<128x128xf32> -> vector<128x128xf32>
    %33 = arith.truncf %32 : vector<128x128xf32> to vector<128x128xbf16>
    %c2 = arith.constant 2 : index
    %c0_25 = arith.constant 0 : index
    %c0_26 = arith.constant 0 : index
    %34 = vector.load %arg4[%c2, %c0_25, %c0_26] : memref<3x128x128xbf16, #tpu.memory_space<vmem>>, vector<1x128x128xbf16>
    %35 = vector.shape_cast %34 : vector<1x128x128xbf16> to vector<128x128xbf16>
    %cst_27 = arith.constant dense<0.000000e+00> : vector<128x128xf32>
    %36 = tpu.matmul %33, %35, %cst_27 {dimension_numbers = #tpu.dot_dimension_numbers<[1], [0], [0], [1], [0, 0, 1, 1], [], []>} : vector<128x128xbf16>, vector<128x128xbf16>, vector<128x128xf32> -> vector<128x128xf32>
    %c2_28 = arith.constant 2 : index
    %c0_29 = arith.constant 0 : index
    %c0_30 = arith.constant 0 : index
    %37 = vector.load %arg5[%c2_28, %c0_29, %c0_30] : memref<3x1x128xf32, #tpu.memory_space<vmem>>, vector<1x1x128xf32>
    %38 = vector.shape_cast %37 : vector<1x1x128xf32> to vector<1x128xf32>
    %39 = vector.broadcast %38 : vector<1x128xf32> to vector<128x128xf32>
    %40 = arith.addf %36, %39 : vector<128x128xf32>
    %cst_31 = arith.constant 0.000000e+00 : f32
    %41 = vector.broadcast %cst_31 : f32 to vector<128x128xf32>
    %42 = arith.maximumf %40, %41 : vector<128x128xf32>
    %43 = arith.truncf %42 : vector<128x128xf32> to vector<128x128xbf16>
    %c0_32 = arith.constant 0 : index
    %c0_33 = arith.constant 0 : index
    %44 = vector.load %arg6[%c0_32, %c0_33] : memref<128x128xbf16, #tpu.memory_space<vmem>>, vector<128x128xbf16>
    %cst_34 = arith.constant dense<0.000000e+00> : vector<128x128xf32>
    %45 = tpu.matmul %43, %44, %cst_34 {dimension_numbers = #tpu.dot_dimension_numbers<[1], [0], [0], [1], [0, 0, 1, 1], [], []>} : vector<128x128xbf16>, vector<128x128xbf16>, vector<128x128xf32> -> vector<128x128xf32>
    %c0_35 = arith.constant 0 : index
    %c0_36 = arith.constant 0 : index
    %46 = vector.load %arg7[%c0_35, %c0_36] : memref<1x128xf32, #tpu.memory_space<vmem>>, vector<1x128xf32>
    %47 = vector.broadcast %46 : vector<1x128xf32> to vector<128x128xf32>
    %48 = arith.addf %45, %47 : vector<128x128xf32>
    %c0_37 = arith.constant 0 : index
    %c0_38 = arith.constant 0 : index
    %49 = vector.load %arg8[%c0_37, %c0_38] : memref<128x128xf32, #tpu.memory_space<vmem>>, vector<128x128xf32>
    tpu.vector_store %arg8[%c0_37, %c0_38], %48 {strides = array<i32>} : memref<128x128xf32, #tpu.memory_space<vmem>>, vector<128x128xf32>,
    return
  }
}

</mosaic_0001>

<bundles_post_ra>
// kernel: gcn_forward.1
= control target key start
LH: loop header
LB: loop body
LE: loop exit
PB: predicated region body
PF: predicated region fallthrough
CT: control target
= control target key end

     0   :  { %s2268_s2 = inlined_call_operand.vmem [shape: bf16[128,128], index: 2, kind: input, shape index: {}]   ;;  %s2269_s1 = inlined_call_operand.vmem [shape: bf16[128,128], index: 1, kind: input, shape index: {}]   ;;  %s2270_s0 = inlined_call_operand.vmem [shape: bf16[128,128], index: 0, kind: input, shape index: {}]   ;;  %s2271_s4 = inlined_call_operand.vmem [shape: bf16[3,128,128], index: 4, kind: input, shape index: {}]   ;;  %s2272_s3 = inlined_call_operand.vmem [shape: f32[1,128], index: 3, kind: input, shape index: {}]   ;;  %s2273_s5 = inlined_call_operand.vmem [shape: f32[3,1,128], index: 5, kind: input, shape index: {}]   ;;  %s2274_s6 = inlined_call_operand.vmem [shape: bf16[128,128], index: 6, kind: input, shape index: {}]   ;;  %s2275_s7 = inlined_call_operand.vmem [shape: f32[1,128], index: 7, kind: input, shape index: {}]   ;;  %s2276_s8 = inlined_call_operand.vmem [shape: f32[128,128], index: 8, kind: output, shape index: {}]  }
   0x1   :  { %v1896_v0 = vld [vmem:[%s2268_s2] sm:$0xff]   ;;  %v1897_v1 = vld [vmem:[%s2268_s2 + $0x8] sm:$0xff]   ;;  %v1898_v2 = vld [vmem:[%s2268_s2 + $0x10] sm:$0xff]  }
   0x2   :  { %1640 = vmatprep.subr.bf16.mxu0 %v1896_v0  ;;  %v1899_v3 = vld [vmem:[%s2268_s2 + $0x18] sm:$0xff]   ;;  %v1904_v4 = vld [vmem:[%s2269_s1] sm:$0xff]   ;;  %v1901_v6 = vld [vmem:[%s2268_s2 + $0x28] sm:$0xff]  }
   0x3   :  { %1641 = vmatpush3.bf16.msra.mxu0 %v1896_v0  ;;  %1656 = vmatprep.mubr.bf16.mxu0 %v1904_v4  ;;  %v1900_v5 = vld [vmem:[%s2268_s2 + $0x20] sm:$0xff]   ;;  %v1902_v7 = vld [vmem:[%s2268_s2 + $0x30] sm:$0xff]   ;;  %v1903_v8 = vld [vmem:[%s2268_s2 + $0x38] sm:$0xff]  }
   0x4   :  { %1642 = vmatprep.subr.bf16.mxu0 %v1897_v1  ;;  %v1905_v9 = vld [vmem:[%s2269_s1 + $0x8] sm:$0xff]   ;;  %v1906_v10 = vld [vmem:[%s2269_s1 + $0x10] sm:$0xff]   ;;  %v1907_v11 = vld [vmem:[%s2269_s1 + $0x18] sm:$0xff]  }
   0x5   :  { %v1908_v12 = vld [vmem:[%s2269_s1 + $0x20] sm:$0xff]   ;;  %v1909_v13 = vld [vmem:[%s2269_s1 + $0x28] sm:$0xff]   ;;  %v1910_v14 = vld [vmem:[%s2269_s1 + $0x30] sm:$0xff]  }
   0x6   :  { %v1911_v15 = vld [vmem:[%s2269_s1 + $0x38] sm:$0xff]   ;;  %v2048_v16 = vld [vmem:[%s2270_s0] sm:$0xff]   ;;  %v1921_v18 = vld [vmem:[%s2271_s4 + $0x8] sm:$0xff]  }
   0x7   :  { %1643 = vmatpush3.bf16.msra.mxu0 %v1897_v1  ;;  %1688 = vmatprep.mubr.bf16.mxu1 %v2048_v16  ;;  %v1920_v17 = vld [vmem:[%s2271_s4] sm:$0xff]   ;;  %v1922_v19 = vld [vmem:[%s2271_s4 + $0x10] sm:$0xff]   ;;  %v1923_v20 = vld [vmem:[%s2271_s4 + $0x18] sm:$0xff]  }
   0x8   :  { %1644 = vmatprep.subr.bf16.mxu0 %v1898_v2  ;;  %v1924_v21 = vld [vmem:[%s2271_s4 + $0x20] sm:$0xff]   ;;  %v1925_v22 = vld [vmem:[%s2271_s4 + $0x28] sm:$0xff]   ;;  %v1926_v23 = vld [vmem:[%s2271_s4 + $0x30] sm:$0xff]  }
   0x9   :  { %v1417_v25 = vld [vmem:[%s2272_s3] ss:$0 sm:$0xff]  ;;  %v2078_v1 = vld [vmem:[%s2270_s0 + $0x8] sm:$0xff]  }
   0xa   :  { %v2095_v4 = vld [vmem:[%s2270_s0 + $0x20] sm:$0xff]  }
   0xb   :  { %1645 = vmatpush3.bf16.msra.mxu0 %v1898_v2  ;;  %v2083_v2 = vld [vmem:[%s2270_s0 + $0x10] sm:$0xff]  }
   0xc   :  { %1646 = vmatprep.subr.bf16.mxu0 %v1899_v3 }
   0xf   :  { %1647 = vmatpush3.bf16.msra.mxu0 %v1899_v3  ;;  %v2090_v3 = vld [vmem:[%s2270_s0 + $0x18] sm:$0xff]  }
  0x10   :  { %1648 = vmatprep.subr.bf16.mxu0 %v1900_v5 }
  0x13   :  { %1649 = vmatpush3.bf16.msra.mxu0 %v1900_v5  ;;  %v2102_v5 = vld [vmem:[%s2270_s0 + $0x28] sm:$0xff]  }
  0x14   :  { %1650 = vmatprep.subr.bf16.mxu0 %v1901_v6 }
  0x17   :  { %1651 = vmatpush3.bf16.msra.mxu0 %v1901_v6  ;;  %v2107_v6 = vld [vmem:[%s2270_s0 + $0x30] sm:$0xff]  }
  0x18   :  { %1652 = vmatprep.subr.bf16.mxu0 %v1902_v7 }
  0x1b   :  { %1653 = vmatpush3.bf16.msra.mxu0 %v1902_v7  ;;  %v2114_v7 = vld [vmem:[%s2270_s0 + $0x38] sm:$0xff]  }
  0x1c   :  { %1654 = vmatprep.subr.bf16.mxu0 %v1903_v8 }
  0x1f   :  { %1655 = vmatpush3.bf16.msra.mxu0 %v1903_v8  ;;  %v1927_v8 = vld [vmem:[%s2271_s4 + $0x38] sm:$0xff]  }
  0x20   :  { %1704 = vmatprep.subr.bf16.mxu0 %v1920_v17 }
  0x22   :  { %1657 = vmatmul.mubr.bf16.vlgmr.msra.gmra.mrb[0].mxu0 %v1905_v9 }
  0x23   :  { %1660 = vmatprep.mubr.bf16.mxu0 %v1906_v10  ;;  %1705 = vmatpush3.bf16.msra.mxu0 %v1920_v17 }
  0x24   :  { %1706 = vmatprep.subr.bf16.mxu0 %v1921_v18 }
  0x27   :  { %1707 = vmatpush3.bf16.msra.mxu0 %v1921_v18 }
  0x28   :  { %1708 = vmatprep.subr.bf16.mxu0 %v1922_v19 }
  0x2a   :  { %1661 = vmatmul.mubr.bf16.gmra.mrb[4].mxu0 %v1907_v11 }
  0x2b   :  { %1664 = vmatprep.mubr.bf16.mxu0 %v1908_v12  ;;  %1709 = vmatpush3.bf16.msra.mxu0 %v1922_v19 }
  0x2c   :  { %1710 = vmatprep.subr.bf16.mxu0 %v1923_v20 }
  0x2f   :  { %1711 = vmatpush3.bf16.msra.mxu0 %v1923_v20 }
  0x30   :  { %1712 = vmatprep.subr.bf16.mxu0 %v1924_v21 }
  0x32   :  { %1665 = vmatmul.mubr.bf16.gmra.mrb[8].mxu0 %v1909_v13 }
  0x33   :  { %1668 = vmatprep.mubr.bf16.mxu0 %v1910_v14  ;;  %1713 = vmatpush3.bf16.msra.mxu0 %v1924_v21 }
  0x34   :  { %1714 = vmatprep.subr.bf16.mxu0 %v1925_v22 }
  0x37   :  { %1715 = vmatpush3.bf16.msra.mxu0 %v1925_v22 }
  0x38   :  { %1716 = vmatprep.subr.bf16.mxu0 %v1926_v23 }
  0x3a   :  { %1669 = vmatmul.mubr.bf16.gmra.mrb[12].mxu0 %v1911_v15 }
  0x3b   :  { %1717 = vmatpush3.bf16.msra.mxu0 %v1926_v23 }
  0x3c   :  { %1718 = vmatprep.subr.bf16.mxu0 %v1927_v8 }
  0x3f   :  { %1719 = vmatpush3.bf16.msra.mxu0 %v1927_v8 }
  0xf5   :  { %v1658_v24 = vpop.f32.mrb[0].mxu0 }
  0xf6   :  { %v215_v26 = vpop.f32.mrb[1].mxu0  ;;  %v224_v28 = vadd.f32 %v1658_v24, %v1417_v25 }
  0xf7   :  { %v1659_v27 = vpop.f32.mrb[2].mxu0  ;;  %v216_v31 = vadd.f32 %v1417_v25, %v215_v26 }
  0xf8   :  { %v227_v29 = vadd.f32 %v1659_v27, %v1417_v25  ;;  %v218_v30 = vpop.f32.mrb[3].mxu0 }
  0xf9   :  { %v219_v32 = vadd.f32 %v1417_v25, %v218_v30 }
  0xfa   :  { %v279_v33 = vpack.c.bf16 %v227_v29, %v224_v28 }
  0xfb   :  { %v278_v34 = vpack.c.bf16 %v219_v32, %v216_v31 }
  0xfd   :  { %v1662_v35 = vpop.f32.mrb[4].mxu0  ;;  %1672 = vmatprep.subr.bf16.mxu1 %v278_v34 }
  0xfe   :  { %v231_v36 = vpop.f32.mrb[5].mxu0  ;;  %1673 = vmatpush3.bf16.msra.mxu1 %v278_v34  ;;  %v240_v38 = vadd.f32 %v1662_v35, %v1417_v25  ;;  %v1928_v34 = vld [vmem:[%s2271_s4 + $0x40] sm:$0xff]   ;;  %v1929_v35 = vld [vmem:[%s2271_s4 + $0x48] sm:$0xff]  }
  0xff   :  { %v1663_v37 = vpop.f32.mrb[6].mxu0  ;;  %1674 = vmatprep.subr.bf16.mxu1 %v279_v33  ;;  %v232_v41 = vadd.f32 %v1417_v25, %v231_v36  ;;  %1768 = vmatprep.subr.bf16.mxu0 %v1928_v34  ;;  %v1930_v36 = vld [vmem:[%s2271_s4 + $0x50] sm:$0xff]  }
 0x100   :  { %v243_v39 = vadd.f32 %v1663_v37, %v1417_v25  ;;  %v234_v40 = vpop.f32.mrb[7].mxu0  ;;  %v1931_v37 = vld [vmem:[%s2271_s4 + $0x58] sm:$0xff]  }
 0x101   :  { %v235_v42 = vadd.f32 %v1417_v25, %v234_v40  ;;  %v1934_v40 = vld [vmem:[%s2271_s4 + $0x70] sm:$0xff]  }
 0x102   :  { %v281_v43 = vpack.c.bf16 %v243_v39, %v240_v38  ;;  %1675 = vmatpush3.bf16.msra.mxu1 %v279_v33  ;;  %v1932_v38 = vld [vmem:[%s2271_s4 + $0x60] sm:$0xff]   ;;  %v1933_v39 = vld [vmem:[%s2271_s4 + $0x68] sm:$0xff]  }
 0x103   :  { %v280_v44 = vpack.c.bf16 %v235_v42, %v232_v41  ;;  %v1442_v41 = vld [vmem:[%s2273_s5] ss:$0 sm:$0xff] }
 0x105   :  { %v1666_v45 = vpop.f32.mrb[8].mxu0  ;;  %1676 = vmatprep.subr.bf16.mxu1 %v280_v44 }
 0x106   :  { %v247_v46 = vpop.f32.mrb[9].mxu0  ;;  %1677 = vmatpush3.bf16.msra.mxu1 %v280_v44  ;;  %v256_v48 = vadd.f32 %v1666_v45, %v1417_v25 }
 0x107   :  { %v1667_v47 = vpop.f32.mrb[10].mxu0  ;;  %1678 = vmatprep.subr.bf16.mxu1 %v281_v43  ;;  %v248_v51 = vadd.f32 %v1417_v25, %v247_v46 }
 0x108   :  { %v259_v49 = vadd.f32 %v1667_v47, %v1417_v25  ;;  %v250_v50 = vpop.f32.mrb[11].mxu0 }
 0x109   :  { %v251_v52 = vadd.f32 %v1417_v25, %v250_v50 }
 0x10a   :  { %v283_v53 = vpack.c.bf16 %v259_v49, %v256_v48  ;;  %1679 = vmatpush3.bf16.msra.mxu1 %v281_v43 }
 0x10b   :  { %v282_v54 = vpack.c.bf16 %v251_v52, %v248_v51 }
 0x10d   :  { %v1670_v55 = vpop.f32.mrb[12].mxu0  ;;  %1680 = vmatprep.subr.bf16.mxu1 %v282_v54 }
 0x10e   :  { %v263_v56 = vpop.f32.mrb[13].mxu0  ;;  %1681 = vmatpush3.bf16.msra.mxu1 %v282_v54  ;;  %v272_v58 = vadd.f32 %v1670_v55, %v1417_v25 }
 0x10f   :  { %v1671_v57 = vpop.f32.mrb[14].mxu0  ;;  %1682 = vmatprep.subr.bf16.mxu1 %v283_v53  ;;  %v264_v61 = vadd.f32 %v1417_v25, %v263_v56 }
 0x110   :  { %v275_v59 = vadd.f32 %v1671_v57, %v1417_v25  ;;  %v266_v60 = vpop.f32.mrb[15].mxu0 }
 0x111   :  { %v267_v62 = vadd.f32 %v1417_v25, %v266_v60 }
 0x112   :  { %v285_v63 = vpack.c.bf16 %v275_v59, %v272_v58  ;;  %1683 = vmatpush3.bf16.msra.mxu1 %v283_v53 }
 0x113   :  { %v284_v0 = vpack.c.bf16 %v267_v62, %v264_v61 }
 0x115   :  { %1684 = vmatprep.subr.bf16.mxu1 %v284_v0 }
 0x116   :  { %1685 = vmatpush3.bf16.msra.mxu1 %v284_v0 }
 0x117   :  { %1686 = vmatprep.subr.bf16.mxu1 %v285_v63 }
 0x11a   :  { %1687 = vmatpush3.bf16.msra.mxu1 %v285_v63 }
 0x11d   :  { %1689 = vmatmul.mubr.bf16.vlgmr.msra.gmra.mrb[0].mxu1 %v2078_v1 }
 0x11e   :  { %1692 = vmatprep.mubr.bf16.mxu1 %v2083_v2 }
 0x125   :  { %1693 = vmatmul.mubr.bf16.gmra.mrb[4].mxu1 %v2090_v3 }
 0x126   :  { %1696 = vmatprep.mubr.bf16.mxu1 %v2095_v4 }
 0x12d   :  { %1697 = vmatmul.mubr.bf16.gmra.mrb[8].mxu1 %v2102_v5 }
 0x12e   :  { %1700 = vmatprep.mubr.bf16.mxu1 %v2107_v6 }
 0x135   :  { %1701 = vmatmul.mubr.bf16.gmra.mrb[12].mxu1 %v2114_v7 }
 0x136   :  { %1752 = vmatprep.mubr.bf16.mxu1 %v2048_v16 }
 0x1f0   :  { %v1690_v9 = vpop.f32.mrb[0].mxu1 }
 0x1f1   :  { %v368_v10 = vpop.f32.mrb[1].mxu1 }
 0x1f2   :  { %v1691_v11 = vpop.f32.mrb[2].mxu1 }
 0x1f3   :  { %v432_v12 = vpack.c.bf16 %v1691_v11, %v1690_v9  ;;  %v371_v13 = vpop.f32.mrb[3].mxu1 }
 0x1f4   :  { %v431_v14 = vpack.c.bf16 %v371_v13, %v368_v10 }
 0x1f6   :  { %1720 = vmatprep.mubr.bf16.mxu0 %v431_v14 }
 0x1f7   :  { %1721 = vmatmul.mubr.bf16.vlgmr.msra.gmra.mrb[16].mxu0 %v432_v12 }
 0x1f8   :  { %v1694_v15 = vpop.f32.mrb[4].mxu1  ;;  %1769 = vmatpush3.bf16.msra.mxu0 %v1928_v34 }
 0x1f9   :  { %v384_v17 = vpop.f32.mrb[5].mxu1  ;;  %1770 = vmatprep.subr.bf16.mxu0 %v1929_v35 }
 0x1fa   :  { %v1695_v18 = vpop.f32.mrb[6].mxu1 }
 0x1fb   :  { %v434_v19 = vpack.c.bf16 %v1695_v18, %v1694_v15  ;;  %v387_v20 = vpop.f32.mrb[7].mxu1 }
 0x1fc   :  { %v433_v21 = vpack.c.bf16 %v387_v20, %v384_v17  ;;  %1771 = vmatpush3.bf16.msra.mxu0 %v1929_v35 }
 0x1fd   :  { %1772 = vmatprep.subr.bf16.mxu0 %v1930_v36 }
 0x1fe   :  { %1724 = vmatprep.mubr.bf16.mxu0 %v433_v21 }
 0x1ff   :  { %1725 = vmatmul.mubr.bf16.gmra.mrb[20].mxu0 %v434_v19 }
 0x200   :  { %v1698_v22 = vpop.f32.mrb[8].mxu1  ;;  %1773 = vmatpush3.bf16.msra.mxu0 %v1930_v36 }
 0x201   :  { %v400_v23 = vpop.f32.mrb[9].mxu1  ;;  %1774 = vmatprep.subr.bf16.mxu0 %v1931_v37 }
 0x202   :  { %v1699_v24 = vpop.f32.mrb[10].mxu1 }
 0x203   :  { %v436_v25 = vpack.c.bf16 %v1699_v24, %v1698_v22  ;;  %v403_v26 = vpop.f32.mrb[11].mxu1 }
 0x204   :  { %v435_v27 = vpack.c.bf16 %v403_v26, %v400_v23  ;;  %1775 = vmatpush3.bf16.msra.mxu0 %v1931_v37 }
 0x205   :  { %1776 = vmatprep.subr.bf16.mxu0 %v1932_v38 }
 0x206   :  { %1728 = vmatprep.mubr.bf16.mxu0 %v435_v27 }
 0x207   :  { %1729 = vmatmul.mubr.bf16.gmra.mrb[24].mxu0 %v436_v25 }
 0x208   :  { %v1702_v28 = vpop.f32.mrb[12].mxu1  ;;  %1777 = vmatpush3.bf16.msra.mxu0 %v1932_v38 }
 0x209   :  { %v416_v29 = vpop.f32.mrb[13].mxu1  ;;  %1778 = vmatprep.subr.bf16.mxu0 %v1933_v39 }
 0x20a   :  { %v1703_v30 = vpop.f32.mrb[14].mxu1 }
 0x20b   :  { %v438_v31 = vpack.c.bf16 %v1703_v30, %v1702_v28  ;;  %v419_v32 = vpop.f32.mrb[15].mxu1 }
 0x20c   :  { %v437_v33 = vpack.c.bf16 %v419_v32, %v416_v29  ;;  %1779 = vmatpush3.bf16.msra.mxu0 %v1933_v39 }
 0x20d   :  { %1780 = vmatprep.subr.bf16.mxu0 %v1934_v40 }
 0x20e   :  { %1732 = vmatprep.mubr.bf16.mxu0 %v437_v33 }
 0x20f   :  { %1733 = vmatmul.mubr.bf16.gmra.mrb[28].mxu0 %v438_v31 }
 0x210   :  { %1781 = vmatpush3.bf16.msra.mxu0 %v1934_v40 }
 0x2ca   :  { %v1722_v42 = vpop.f32.mrb[16].mxu0 }
 0x2cb   :  { %v553_v43 = vadd.f32 %v1722_v42, %v1442_v41  ;;  %v544_v44 = vpop.f32.mrb[17].mxu0 }
 0x2cc   :  { %v545_v45 = vadd.f32 %v1442_v41, %v544_v44  ;;  %v1723_v46 = vpop.f32.mrb[18].mxu0 }
 0x2cd   :  { %v556_v47 = vadd.f32 %v1723_v46, %v1442_v41  ;;  %v547_v48 = vpop.f32.mrb[19].mxu0  ;;  %v609_v50 = vmax.f32 %v553_v43, 0.0 }
 0x2ce   :  { %v548_v49 = vadd.f32 %v1442_v41, %v547_v48  ;;  %v607_v52 = vmax.f32 %v545_v45, 0.0 }
 0x2cf   :  { %v610_v51 = vmax.f32 %v556_v47, 0.0 }
 0x2d0   :  { %v608_v53 = vmax.f32 %v548_v49, 0.0 }
 0x2d1   :  { %v624_v54 = vpack.c.bf16 %v610_v51, %v609_v50 }
 0x2d2   :  { %v623_v55 = vpack.c.bf16 %v608_v53, %v607_v52  ;;  %v1726_v56 = vpop.f32.mrb[20].mxu0 }
 0x2d3   :  { %v569_v57 = vadd.f32 %v1726_v56, %v1442_v41  ;;  %v560_v58 = vpop.f32.mrb[21].mxu0 }
 0x2d4   :  { %v561_v59 = vadd.f32 %v1442_v41, %v560_v58  ;;  %v1727_v60 = vpop.f32.mrb[22].mxu0  ;;  %1736 = vmatprep.subr.bf16.mxu1 %v623_v55 }
 0x2d5   :  { %v572_v61 = vadd.f32 %v1727_v60, %v1442_v41  ;;  %v563_v62 = vpop.f32.mrb[23].mxu0  ;;  %1737 = vmatpush3.bf16.msra.mxu1 %v623_v55  ;;  %v613_v0 = vmax.f32 %v569_v57, 0.0 }
 0x2d6   :  { %v564_v63 = vadd.f32 %v1442_v41, %v563_v62  ;;  %1738 = vmatprep.subr.bf16.mxu1 %v624_v54  ;;  %v611_v9 = vmax.f32 %v561_v59, 0.0 }
 0x2d7   :  { %v614_v8 = vmax.f32 %v572_v61, 0.0 }
 0x2d8   :  { %v612_v10 = vmax.f32 %v564_v63, 0.0 }
 0x2d9   :  { %v626_v11 = vpack.c.bf16 %v614_v8, %v613_v0  ;;  %1739 = vmatpush3.bf16.msra.mxu1 %v624_v54 }
 0x2da   :  { %v625_v12 = vpack.c.bf16 %v612_v10, %v611_v9  ;;  %v1730_v13 = vpop.f32.mrb[24].mxu0  ;;  %v1936_v9 = vld [vmem:[%s2271_s4 + $0x80] sm:$0xff]   ;;  %v1937_v10 = vld [vmem:[%s2271_s4 + $0x88] sm:$0xff]  }
 0x2db   :  { %v585_v14 = vadd.f32 %v1730_v13, %v1442_v41  ;;  %v576_v15 = vpop.f32.mrb[25].mxu0  ;;  %v1940_v13 = vld [vmem:[%s2271_s4 + $0xa0] sm:$0xff]  }
 0x2dc   :  { %v577_v17 = vadd.f32 %v1442_v41, %v576_v15  ;;  %v1731_v18 = vpop.f32.mrb[26].mxu0  ;;  %1740 = vmatprep.subr.bf16.mxu1 %v625_v12  ;;  %v1942_v15 = vld [vmem:[%s2271_s4 + $0xb0] sm:$0xff]  }
 0x2dd   :  { %v588_v19 = vadd.f32 %v1731_v18, %v1442_v41  ;;  %v579_v20 = vpop.f32.mrb[27].mxu0  ;;  %1741 = vmatpush3.bf16.msra.mxu1 %v625_v12  ;;  %v617_v22 = vmax.f32 %v585_v14, 0.0  ;;  %v1939_v12 = vld [vmem:[%s2271_s4 + $0x98] sm:$0xff]   ;;  %v1941_v14 = vld [vmem:[%s2271_s4 + $0xa8] sm:$0xff]  }
 0x2de   :  { %v580_v21 = vadd.f32 %v1442_v41, %v579_v20  ;;  %1742 = vmatprep.subr.bf16.mxu1 %v626_v11  ;;  %v615_v24 = vmax.f32 %v577_v17, 0.0  ;;  %v1468_v17 = vld [vmem:[%s2273_s5 + $0x1] ss:$0 sm:$0xff] }
 0x2df   :  { %v618_v23 = vmax.f32 %v588_v19, 0.0 }
 0x2e0   :  { %v616_v25 = vmax.f32 %v580_v21, 0.0 }
 0x2e1   :  { %v628_v26 = vpack.c.bf16 %v618_v23, %v617_v22  ;;  %1743 = vmatpush3.bf16.msra.mxu1 %v626_v11  ;;  %v1938_v11 = vld [vmem:[%s2271_s4 + $0x90] sm:$0xff]  }
 0x2e2   :  { %v627_v27 = vpack.c.bf16 %v616_v25, %v615_v24  ;;  %v1734_v28 = vpop.f32.mrb[28].mxu0 }
 0x2e3   :  { %v601_v29 = vadd.f32 %v1734_v28, %v1442_v41  ;;  %v592_v30 = vpop.f32.mrb[29].mxu0 }
 0x2e4   :  { %v593_v31 = vadd.f32 %v1442_v41, %v592_v30  ;;  %v1735_v32 = vpop.f32.mrb[30].mxu0  ;;  %1744 = vmatprep.subr.bf16.mxu1 %v627_v27 }
 0x2e5   :  { %v604_v33 = vadd.f32 %v1735_v32, %v1442_v41  ;;  %v595_v34 = vpop.f32.mrb[31].mxu0  ;;  %1745 = vmatpush3.bf16.msra.mxu1 %v627_v27  ;;  %v621_v36 = vmax.f32 %v601_v29, 0.0 }
 0x2e6   :  { %v596_v35 = vadd.f32 %v1442_v41, %v595_v34  ;;  %1746 = vmatprep.subr.bf16.mxu1 %v628_v26  ;;  %v619_v38 = vmax.f32 %v593_v31, 0.0  ;;  %v1935_v41 = vld [vmem:[%s2271_s4 + $0x78] sm:$0xff]  }
 0x2e7   :  { %v622_v37 = vmax.f32 %v604_v33, 0.0  ;;  %1782 = vmatprep.subr.bf16.mxu0 %v1935_v41 }
 0x2e8   :  { %v620_v39 = vmax.f32 %v596_v35, 0.0  ;;  %1783 = vmatpush3.bf16.msra.mxu0 %v1935_v41 }
 0x2e9   :  { %v630_v40 = vpack.c.bf16 %v622_v37, %v621_v36  ;;  %1747 = vmatpush3.bf16.msra.mxu1 %v628_v26  ;;  %1832 = vmatprep.subr.bf16.mxu0 %v1936_v9 }
 0x2ea   :  { %v629_v42 = vpack.c.bf16 %v620_v39, %v619_v38 }
 0x2ec   :  { %1748 = vmatprep.subr.bf16.mxu1 %v629_v42 }
 0x2ed   :  { %1749 = vmatpush3.bf16.msra.mxu1 %v629_v42 }
 0x2ee   :  { %1750 = vmatprep.subr.bf16.mxu1 %v630_v40 }
 0x2f1   :  { %1751 = vmatpush3.bf16.msra.mxu1 %v630_v40 }
 0x2f4   :  { %1753 = vmatmul.mubr.bf16.vlgmr.msra.gmra.mrb[16].mxu1 %v2078_v1 }
 0x2f5   :  { %1756 = vmatprep.mubr.bf16.mxu1 %v2083_v2 }
 0x2fc   :  { %1757 = vmatmul.mubr.bf16.gmra.mrb[20].mxu1 %v2090_v3 }
 0x2fd   :  { %1760 = vmatprep.mubr.bf16.mxu1 %v2095_v4 }
 0x304   :  { %1761 = vmatmul.mubr.bf16.gmra.mrb[24].mxu1 %v2102_v5 }
 0x305   :  { %1764 = vmatprep.mubr.bf16.mxu1 %v2107_v6 }
 0x30c   :  { %1765 = vmatmul.mubr.bf16.gmra.mrb[28].mxu1 %v2114_v7 }
 0x30d   :  { %1816 = vmatprep.mubr.bf16.mxu1 %v2048_v16 }
 0x3c7   :  { %v1754_v43 = vpop.f32.mrb[16].mxu1 }
 0x3c8   :  { %v665_v44 = vpop.f32.mrb[17].mxu1 }
 0x3c9   :  { %v1755_v45 = vpop.f32.mrb[18].mxu1 }
 0x3ca   :  { %v729_v46 = vpack.c.bf16 %v1755_v45, %v1754_v43  ;;  %v668_v47 = vpop.f32.mrb[19].mxu1 }
 0x3cb   :  { %v728_v48 = vpack.c.bf16 %v668_v47, %v665_v44 }
 0x3cd   :  { %1784 = vmatprep.mubr.bf16.mxu0 %v728_v48 }
 0x3ce   :  { %1785 = vmatmul.mubr.bf16.vlgmr.msra.gmra.mrb[32].mxu0 %v729_v46 }
 0x3cf   :  { %v1758_v49 = vpop.f32.mrb[20].mxu1  ;;  %1833 = vmatpush3.bf16.msra.mxu0 %v1936_v9 }
 0x3d0   :  { %v681_v50 = vpop.f32.mrb[21].mxu1  ;;  %1834 = vmatprep.subr.bf16.mxu0 %v1937_v10 }
 0x3d1   :  { %v1759_v51 = vpop.f32.mrb[22].mxu1 }
 0x3d2   :  { %v731_v52 = vpack.c.bf16 %v1759_v51, %v1758_v49  ;;  %v684_v53 = vpop.f32.mrb[23].mxu1 }
 0x3d3   :  { %v730_v16 = vpack.c.bf16 %v684_v53, %v681_v50  ;;  %1835 = vmatpush3.bf16.msra.mxu0 %v1937_v10 }
 0x3d4   :  { %1836 = vmatprep.subr.bf16.mxu0 %v1938_v11 }
 0x3d5   :  { %1788 = vmatprep.mubr.bf16.mxu0 %v730_v16 }
 0x3d6   :  { %1789 = vmatmul.mubr.bf16.gmra.mrb[36].mxu0 %v731_v52 }
 0x3d7   :  { %v1762_v54 = vpop.f32.mrb[24].mxu1  ;;  %1837 = vmatpush3.bf16.msra.mxu0 %v1938_v11 }
 0x3d8   :  { %v697_v55 = vpop.f32.mrb[25].mxu1  ;;  %1838 = vmatprep.subr.bf16.mxu0 %v1939_v12 }
 0x3d9   :  { %v1763_v56 = vpop.f32.mrb[26].mxu1 }
 0x3da   :  { %v733_v57 = vpack.c.bf16 %v1763_v56, %v1762_v54  ;;  %v700_v58 = vpop.f32.mrb[27].mxu1 }
 0x3db   :  { %v732_v59 = vpack.c.bf16 %v700_v58, %v697_v55  ;;  %1839 = vmatpush3.bf16.msra.mxu0 %v1939_v12 }
 0x3dc   :  { %1840 = vmatprep.subr.bf16.mxu0 %v1940_v13 }
 0x3dd   :  { %1792 = vmatprep.mubr.bf16.mxu0 %v732_v59 }
 0x3de   :  { %1793 = vmatmul.mubr.bf16.gmra.mrb[40].mxu0 %v733_v57 }
 0x3df   :  { %v1766_v60 = vpop.f32.mrb[28].mxu1  ;;  %1841 = vmatpush3.bf16.msra.mxu0 %v1940_v13 }
 0x3e0   :  { %v713_v61 = vpop.f32.mrb[29].mxu1  ;;  %1842 = vmatprep.subr.bf16.mxu0 %v1941_v14 }
 0x3e1   :  { %v1767_v62 = vpop.f32.mrb[30].mxu1 }
 0x3e2   :  { %v735_v63 = vpack.c.bf16 %v1767_v62, %v1766_v60  ;;  %v716_v0 = vpop.f32.mrb[31].mxu1 }
 0x3e3   :  { %v734_v8 = vpack.c.bf16 %v716_v0, %v713_v61  ;;  %1843 = vmatpush3.bf16.msra.mxu0 %v1941_v14 }
 0x3e4   :  { %1844 = vmatprep.subr.bf16.mxu0 %v1942_v15 }
 0x3e5   :  { %1796 = vmatprep.mubr.bf16.mxu0 %v734_v8 }
 0x3e6   :  { %1797 = vmatmul.mubr.bf16.gmra.mrb[44].mxu0 %v735_v63 }
 0x3e7   :  { %1845 = vmatpush3.bf16.msra.mxu0 %v1942_v15 }
 0x4a1   :  { %v1786_v18 = vpop.f32.mrb[32].mxu0 }
 0x4a2   :  { %v852_v19 = vadd.f32 %v1786_v18, %v1468_v17  ;;  %v843_v20 = vpop.f32.mrb[33].mxu0 }
 0x4a3   :  { %v844_v21 = vadd.f32 %v1468_v17, %v843_v20  ;;  %v1787_v22 = vpop.f32.mrb[34].mxu0 }
 0x4a4   :  { %v855_v23 = vadd.f32 %v1787_v22, %v1468_v17  ;;  %v846_v24 = vpop.f32.mrb[35].mxu0  ;;  %v908_v26 = vmax.f32 %v852_v19, 0.0 }
 0x4a5   :  { %v847_v25 = vadd.f32 %v1468_v17, %v846_v24  ;;  %v906_v28 = vmax.f32 %v844_v21, 0.0 }
 0x4a6   :  { %v909_v27 = vmax.f32 %v855_v23, 0.0 }
 0x4a7   :  { %v907_v29 = vmax.f32 %v847_v25, 0.0 }
 0x4a8   :  { %v923_v30 = vpack.c.bf16 %v909_v27, %v908_v26 }
 0x4a9   :  { %v922_v31 = vpack.c.bf16 %v907_v29, %v906_v28  ;;  %v1790_v32 = vpop.f32.mrb[36].mxu0 }
 0x4aa   :  { %v868_v33 = vadd.f32 %v1790_v32, %v1468_v17  ;;  %v859_v34 = vpop.f32.mrb[37].mxu0 }
 0x4ab   :  { %v860_v35 = vadd.f32 %v1468_v17, %v859_v34  ;;  %v1791_v36 = vpop.f32.mrb[38].mxu0  ;;  %1800 = vmatprep.subr.bf16.mxu1 %v922_v31 }
 0x4ac   :  { %v871_v37 = vadd.f32 %v1791_v36, %v1468_v17  ;;  %v862_v38 = vpop.f32.mrb[39].mxu0  ;;  %1801 = vmatpush3.bf16.msra.mxu1 %v922_v31  ;;  %v912_v40 = vmax.f32 %v868_v33, 0.0 }
 0x4ad   :  { %v863_v39 = vadd.f32 %v1468_v17, %v862_v38  ;;  %1802 = vmatprep.subr.bf16.mxu1 %v923_v30  ;;  %v910_v41 = vmax.f32 %v860_v35, 0.0 }
 0x4ae   :  { %v913_v42 = vmax.f32 %v871_v37, 0.0 }
 0x4af   :  { %v911_v43 = vmax.f32 %v863_v39, 0.0 }
 0x4b0   :  { %v925_v44 = vpack.c.bf16 %v913_v42, %v912_v40  ;;  %1803 = vmatpush3.bf16.msra.mxu1 %v923_v30  ;;  %v1950_v42 = vld [vmem:[%s2274_s6 + $0x30] sm:$0xff]  }
 0x4b1   :  { %v924_v45 = vpack.c.bf16 %v911_v43, %v910_v41  ;;  %v1794_v46 = vpop.f32.mrb[40].mxu0  ;;  %v1951_v41 = vld [vmem:[%s2274_s6 + $0x38] sm:$0xff]   ;;  %v1494_v43 = vld [vmem:[%s2273_s5 + $0x2] ss:$0 sm:$0xff] }
 0x4b2   :  { %v884_v47 = vadd.f32 %v1794_v46, %v1468_v17  ;;  %v875_v48 = vpop.f32.mrb[41].mxu0 }
 0x4b3   :  { %v876_v49 = vadd.f32 %v1468_v17, %v875_v48  ;;  %v1795_v50 = vpop.f32.mrb[42].mxu0  ;;  %1804 = vmatprep.subr.bf16.mxu1 %v924_v45 }
 0x4b4   :  { %v887_v51 = vadd.f32 %v1795_v50, %v1468_v17  ;;  %v878_v52 = vpop.f32.mrb[43].mxu0  ;;  %1805 = vmatpush3.bf16.msra.mxu1 %v924_v45  ;;  %v916_v16 = vmax.f32 %v884_v47, 0.0 }
 0x4b5   :  { %v879_v53 = vadd.f32 %v1468_v17, %v878_v52  ;;  %1806 = vmatprep.subr.bf16.mxu1 %v925_v44  ;;  %v914_v55 = vmax.f32 %v876_v49, 0.0 }
 0x4b6   :  { %v917_v54 = vmax.f32 %v887_v51, 0.0 }
 0x4b7   :  { %v915_v56 = vmax.f32 %v879_v53, 0.0 }
 0x4b8   :  { %v927_v57 = vpack.c.bf16 %v917_v54, %v916_v16  ;;  %1807 = vmatpush3.bf16.msra.mxu1 %v925_v44 }
 0x4b9   :  { %v926_v58 = vpack.c.bf16 %v915_v56, %v914_v55  ;;  %v1798_v59 = vpop.f32.mrb[44].mxu0 }
 0x4ba   :  { %v900_v60 = vadd.f32 %v1798_v59, %v1468_v17  ;;  %v891_v61 = vpop.f32.mrb[45].mxu0 }
 0x4bb   :  { %v892_v62 = vadd.f32 %v1468_v17, %v891_v61  ;;  %v1799_v63 = vpop.f32.mrb[46].mxu0  ;;  %1808 = vmatprep.subr.bf16.mxu1 %v926_v58 }
 0x4bc   :  { %v903_v0 = vadd.f32 %v1799_v63, %v1468_v17  ;;  %v894_v8 = vpop.f32.mrb[47].mxu0  ;;  %1809 = vmatpush3.bf16.msra.mxu1 %v926_v58  ;;  %v920_v10 = vmax.f32 %v900_v60, 0.0 }
 0x4bd   :  { %v895_v9 = vadd.f32 %v1468_v17, %v894_v8  ;;  %1810 = vmatprep.subr.bf16.mxu1 %v927_v57  ;;  %v918_v12 = vmax.f32 %v892_v62, 0.0  ;;  %v1943_v17 = vld [vmem:[%s2271_s4 + $0xb8] sm:$0xff]  }
 0x4be   :  { %v921_v11 = vmax.f32 %v903_v0, 0.0  ;;  %1846 = vmatprep.subr.bf16.mxu0 %v1943_v17 }
 0x4bf   :  { %v919_v13 = vmax.f32 %v895_v9, 0.0  ;;  %1847 = vmatpush3.bf16.msra.mxu0 %v1943_v17 }
 0x4c0   :  { %v929_v14 = vpack.c.bf16 %v921_v11, %v920_v10  ;;  %1811 = vmatpush3.bf16.msra.mxu1 %v927_v57 }
 0x4c1   :  { %v928_v15 = vpack.c.bf16 %v919_v13, %v918_v12 }
 0x4c3   :  { %1812 = vmatprep.subr.bf16.mxu1 %v928_v15 }
 0x4c4   :  { %1813 = vmatpush3.bf16.msra.mxu1 %v928_v15 }
 0x4c5   :  { %1814 = vmatprep.subr.bf16.mxu1 %v929_v14 }
 0x4c8   :  { %1815 = vmatpush3.bf16.msra.mxu1 %v929_v14 }
 0x4cb   :  { %1817 = vmatmul.mubr.bf16.vlgmr.msra.gmra.mrb[32].mxu1 %v2078_v1  ;;  %v1944_v1 = vld [vmem:[%s2274_s6] sm:$0xff]  }
 0x4cc   :  { %1820 = vmatprep.mubr.bf16.mxu1 %v2083_v2  ;;  %v1945_v2 = vld [vmem:[%s2274_s6 + $0x8] sm:$0xff]   ;;  %1864 = vmatprep.subr.bf16.mxu1 %v1944_v1 }
 0x4cd   :  { %1865 = vmatpush3.bf16.msra.mxu1 %v1944_v1 }
 0x4ce   :  { %1866 = vmatprep.subr.bf16.mxu1 %v1945_v2 }
 0x4d1   :  { %1867 = vmatpush3.bf16.msra.mxu1 %v1945_v2 }
 0x4d3   :  { %1821 = vmatmul.mubr.bf16.gmra.mrb[36].mxu1 %v2090_v3  ;;  %v1946_v3 = vld [vmem:[%s2274_s6 + $0x10] sm:$0xff]  }
 0x4d4   :  { %1824 = vmatprep.mubr.bf16.mxu1 %v2095_v4  ;;  %1868 = vmatprep.subr.bf16.mxu1 %v1946_v3  ;;  %v1947_v4 = vld [vmem:[%s2274_s6 + $0x18] sm:$0xff]  }
 0x4d5   :  { %1869 = vmatpush3.bf16.msra.mxu1 %v1946_v3 }
 0x4d6   :  { %1870 = vmatprep.subr.bf16.mxu1 %v1947_v4 }
 0x4d9   :  { %1871 = vmatpush3.bf16.msra.mxu1 %v1947_v4 }
 0x4db   :  { %1825 = vmatmul.mubr.bf16.gmra.mrb[40].mxu1 %v2102_v5  ;;  %v1948_v5 = vld [vmem:[%s2274_s6 + $0x20] sm:$0xff]  }
 0x4dc   :  { %1828 = vmatprep.mubr.bf16.mxu1 %v2107_v6  ;;  %1872 = vmatprep.subr.bf16.mxu1 %v1948_v5  ;;  %v1949_v6 = vld [vmem:[%s2274_s6 + $0x28] sm:$0xff]  }
 0x4dd   :  { %1873 = vmatpush3.bf16.msra.mxu1 %v1948_v5 }
 0x4de   :  { %1874 = vmatprep.subr.bf16.mxu1 %v1949_v6 }
 0x4e1   :  { %1875 = vmatpush3.bf16.msra.mxu1 %v1949_v6 }
 0x4e2   :  { %1876 = vmatprep.subr.bf16.mxu1 %v1950_v42 }
 0x4e3   :  { %1829 = vmatmul.mubr.bf16.gmra.mrb[44].mxu1 %v2114_v7 }
 0x4e5   :  { %1877 = vmatpush3.bf16.msra.mxu1 %v1950_v42 }
 0x4e6   :  { %1878 = vmatprep.subr.bf16.mxu1 %v1951_v41 }
 0x4e9   :  { %1879 = vmatpush3.bf16.msra.mxu1 %v1951_v41 }
 0x59e   :  { %v1818_v7 = vpop.f32.mrb[32].mxu1 }
 0x59f   :  { %v964_v18 = vpop.f32.mrb[33].mxu1 }
 0x5a0   :  { %v1819_v19 = vpop.f32.mrb[34].mxu1 }
 0x5a1   :  { %v1028_v20 = vpack.c.bf16 %v1819_v19, %v1818_v7  ;;  %v967_v21 = vpop.f32.mrb[35].mxu1 }
 0x5a2   :  { %v1027_v22 = vpack.c.bf16 %v967_v21, %v964_v18 }
 0x5a4   :  { %1848 = vmatprep.mubr.bf16.mxu0 %v1027_v22 }
 0x5a5   :  { %1849 = vmatmul.mubr.bf16.vlgmr.msra.gmra.mrb[48].mxu0 %v1028_v20 }
 0x5a6   :  { %v1822_v23 = vpop.f32.mrb[36].mxu1 }
 0x5a7   :  { %v980_v24 = vpop.f32.mrb[37].mxu1 }
 0x5a8   :  { %v1823_v25 = vpop.f32.mrb[38].mxu1 }
 0x5a9   :  { %v1030_v26 = vpack.c.bf16 %v1823_v25, %v1822_v23  ;;  %v983_v27 = vpop.f32.mrb[39].mxu1 }
 0x5aa   :  { %v1029_v28 = vpack.c.bf16 %v983_v27, %v980_v24 }
 0x5ac   :  { %1852 = vmatprep.mubr.bf16.mxu0 %v1029_v28 }
 0x5ad   :  { %1853 = vmatmul.mubr.bf16.gmra.mrb[52].mxu0 %v1030_v26 }
 0x5ae   :  { %v1826_v29 = vpop.f32.mrb[40].mxu1 }
 0x5af   :  { %v996_v30 = vpop.f32.mrb[41].mxu1 }
 0x5b0   :  { %v1827_v31 = vpop.f32.mrb[42].mxu1 }
 0x5b1   :  { %v1032_v32 = vpack.c.bf16 %v1827_v31, %v1826_v29  ;;  %v999_v33 = vpop.f32.mrb[43].mxu1 }
 0x5b2   :  { %v1031_v34 = vpack.c.bf16 %v999_v33, %v996_v30 }
 0x5b4   :  { %1856 = vmatprep.mubr.bf16.mxu0 %v1031_v34 }
 0x5b5   :  { %1857 = vmatmul.mubr.bf16.gmra.mrb[56].mxu0 %v1032_v32 }
 0x5b6   :  { %v1830_v35 = vpop.f32.mrb[44].mxu1 }
 0x5b7   :  { %v1012_v36 = vpop.f32.mrb[45].mxu1 }
 0x5b8   :  { %v1831_v37 = vpop.f32.mrb[46].mxu1 }
 0x5b9   :  { %v1034_v38 = vpack.c.bf16 %v1831_v37, %v1830_v35  ;;  %v1015_v39 = vpop.f32.mrb[47].mxu1 }
 0x5ba   :  { %v1033_v40 = vpack.c.bf16 %v1015_v39, %v1012_v36  ;;  %v1503_v36 = vld [vmem:[%s2275_s7] ss:$0 sm:$0xff] }
 0x5bc   :  { %1860 = vmatprep.mubr.bf16.mxu0 %v1033_v40 }
 0x5bd   :  { %1861 = vmatmul.mubr.bf16.gmra.mrb[60].mxu0 %v1034_v38 }
 0x678   :  { %v1850_v44 = vpop.f32.mrb[48].mxu0 }
 0x679   :  { %v1151_v45 = vadd.f32 %v1850_v44, %v1494_v43  ;;  %v1142_v46 = vpop.f32.mrb[49].mxu0 }
 0x67a   :  { %v1143_v47 = vadd.f32 %v1494_v43, %v1142_v46  ;;  %v1851_v48 = vpop.f32.mrb[50].mxu0 }
 0x67b   :  { %v1154_v49 = vadd.f32 %v1851_v48, %v1494_v43  ;;  %v1145_v50 = vpop.f32.mrb[51].mxu0  ;;  %v1207_v52 = vmax.f32 %v1151_v45, 0.0 }
 0x67c   :  { %v1146_v51 = vadd.f32 %v1494_v43, %v1145_v50  ;;  %v1205_v16 = vmax.f32 %v1143_v47, 0.0 }
 0x67d   :  { %v1208_v53 = vmax.f32 %v1154_v49, 0.0 }
 0x67e   :  { %v1206_v54 = vmax.f32 %v1146_v51, 0.0 }
 0x67f   :  { %v1222_v55 = vpack.c.bf16 %v1208_v53, %v1207_v52 }
 0x680   :  { %v1221_v56 = vpack.c.bf16 %v1206_v54, %v1205_v16  ;;  %v1854_v57 = vpop.f32.mrb[52].mxu0 }
 0x681   :  { %v1167_v58 = vadd.f32 %v1854_v57, %v1494_v43  ;;  %v1158_v59 = vpop.f32.mrb[53].mxu0 }
 0x682   :  { %v1159_v60 = vadd.f32 %v1494_v43, %v1158_v59  ;;  %v1855_v61 = vpop.f32.mrb[54].mxu0  ;;  %1880 = vmatprep.mubr.bf16.mxu1 %v1221_v56 }
 0x683   :  { %v1170_v62 = vadd.f32 %v1855_v61, %v1494_v43  ;;  %v1161_v63 = vpop.f32.mrb[55].mxu0  ;;  %1881 = vmatmul.mubr.bf16.vlgmr.msra.gmra.mrb[48].mxu1 %v1222_v55  ;;  %v1211_v8 = vmax.f32 %v1167_v58, 0.0 }
 0x684   :  { %v1162_v0 = vadd.f32 %v1494_v43, %v1161_v63  ;;  %v1209_v10 = vmax.f32 %v1159_v60, 0.0 }
 0x685   :  { %v1212_v9 = vmax.f32 %v1170_v62, 0.0 }
 0x686   :  { %v1210_v11 = vmax.f32 %v1162_v0, 0.0 }
 0x687   :  { %v1224_v12 = vpack.c.bf16 %v1212_v9, %v1211_v8 }
 0x688   :  { %v1223_v13 = vpack.c.bf16 %v1210_v11, %v1209_v10  ;;  %v1858_v14 = vpop.f32.mrb[56].mxu0 }
 0x689   :  { %v1183_v15 = vadd.f32 %v1858_v14, %v1494_v43  ;;  %v1174_v17 = vpop.f32.mrb[57].mxu0 }
 0x68a   :  { %v1175_v1 = vadd.f32 %v1494_v43, %v1174_v17  ;;  %v1859_v2 = vpop.f32.mrb[58].mxu0  ;;  %1884 = vmatprep.mubr.bf16.mxu1 %v1223_v13 }
 0x68b   :  { %v1186_v3 = vadd.f32 %v1859_v2, %v1494_v43  ;;  %v1177_v4 = vpop.f32.mrb[59].mxu0  ;;  %1885 = vmatmul.mubr.bf16.gmra.mrb[52].mxu1 %v1224_v12  ;;  %v1215_v6 = vmax.f32 %v1183_v15, 0.0 }
 0x68c   :  { %v1178_v5 = vadd.f32 %v1494_v43, %v1177_v4  ;;  %v1213_v18 = vmax.f32 %v1175_v1, 0.0 }
 0x68d   :  { %v1216_v7 = vmax.f32 %v1186_v3, 0.0 }
 0x68e   :  { %v1214_v19 = vmax.f32 %v1178_v5, 0.0 }
 0x68f   :  { %v1226_v20 = vpack.c.bf16 %v1216_v7, %v1215_v6 }
 0x690   :  { %v1225_v21 = vpack.c.bf16 %v1214_v19, %v1213_v18  ;;  %v1862_v22 = vpop.f32.mrb[60].mxu0 }
 0x691   :  { %v1199_v23 = vadd.f32 %v1862_v22, %v1494_v43  ;;  %v1190_v24 = vpop.f32.mrb[61].mxu0 }
 0x692   :  { %v1191_v25 = vadd.f32 %v1494_v43, %v1190_v24  ;;  %v1863_v26 = vpop.f32.mrb[62].mxu0  ;;  %1888 = vmatprep.mubr.bf16.mxu1 %v1225_v21 }
 0x693   :  { %v1202_v27 = vadd.f32 %v1863_v26, %v1494_v43  ;;  %v1193_v28 = vpop.f32.mrb[63].mxu0  ;;  %1889 = vmatmul.mubr.bf16.gmra.mrb[56].mxu1 %v1226_v20  ;;  %v1219_v30 = vmax.f32 %v1199_v23, 0.0 }
 0x694   :  { %v1194_v29 = vadd.f32 %v1494_v43, %v1193_v28  ;;  %v1217_v32 = vmax.f32 %v1191_v25, 0.0 }
 0x695   :  { %v1220_v31 = vmax.f32 %v1202_v27, 0.0 }
 0x696   :  { %v1218_v33 = vmax.f32 %v1194_v29, 0.0 }
 0x697   :  { %v1228_v34 = vpack.c.bf16 %v1220_v31, %v1219_v30 }
 0x698   :  { %v1227_v35 = vpack.c.bf16 %v1218_v33, %v1217_v32 }
 0x69a   :  { %1892 = vmatprep.mubr.bf16.mxu1 %v1227_v35 }
 0x69b   :  { %1893 = vmatmul.mubr.bf16.gmra.mrb[60].mxu1 %v1228_v34 }
 0x756   :  { %v1882_v37 = vpop.f32.mrb[48].mxu1 }
 0x757   :  { %v1343_v38 = vadd.f32 %v1882_v37, %v1503_v36  ;;  %v1334_v39 = vpop.f32.mrb[49].mxu1 }
 0x758   :  { %v1335_v40 = vadd.f32 %v1503_v36, %v1334_v39  ;;  %v1883_v42 = vpop.f32.mrb[50].mxu1 }
 0x759   :  { %1399 = vst [vmem:[%s2276_s8 + $0x10] sm:$0xff] %v1343_v38  ;;  %v1346_v41 = vadd.f32 %v1883_v42, %v1503_v36  ;;  %v1337_v43 = vpop.f32.mrb[51].mxu1 }
 0x75a   :  { %1397 = vst [vmem:[%s2276_s8] sm:$0xff] %v1335_v40  ;;  %v1338_v44 = vadd.f32 %v1503_v36, %v1337_v43 }
 0x75b   :  { %1400 = vst [vmem:[%s2276_s8 + $0x18] sm:$0xff] %v1346_v41 }
 0x75c   :  { %1398 = vst [vmem:[%s2276_s8 + $0x8] sm:$0xff] %v1338_v44 }
 0x75e   :  { %v1886_v45 = vpop.f32.mrb[52].mxu1 }
 0x75f   :  { %v1359_v46 = vadd.f32 %v1886_v45, %v1503_v36  ;;  %v1350_v47 = vpop.f32.mrb[53].mxu1 }
 0x760   :  { %v1351_v48 = vadd.f32 %v1503_v36, %v1350_v47  ;;  %v1887_v49 = vpop.f32.mrb[54].mxu1 }
 0x761   :  { %1403 = vst [vmem:[%s2276_s8 + $0x30] sm:$0xff] %v1359_v46  ;;  %v1362_v50 = vadd.f32 %v1887_v49, %v1503_v36  ;;  %v1353_v51 = vpop.f32.mrb[55].mxu1 }
 0x762   :  { %1401 = vst [vmem:[%s2276_s8 + $0x20] sm:$0xff] %v1351_v48  ;;  %v1354_v52 = vadd.f32 %v1503_v36, %v1353_v51 }
 0x763   :  { %1404 = vst [vmem:[%s2276_s8 + $0x38] sm:$0xff] %v1362_v50 }
 0x764   :  { %1402 = vst [vmem:[%s2276_s8 + $0x28] sm:$0xff] %v1354_v52 }
 0x766   :  { %v1890_v53 = vpop.f32.mrb[56].mxu1 }
 0x767   :  { %v1375_v16 = vadd.f32 %v1890_v53, %v1503_v36  ;;  %v1366_v54 = vpop.f32.mrb[57].mxu1 }
 0x768   :  { %v1367_v55 = vadd.f32 %v1503_v36, %v1366_v54  ;;  %v1891_v56 = vpop.f32.mrb[58].mxu1 }
 0x769   :  { %1407 = vst [vmem:[%s2276_s8 + $0x50] sm:$0xff] %v1375_v16  ;;  %v1378_v57 = vadd.f32 %v1891_v56, %v1503_v36  ;;  %v1369_v58 = vpop.f32.mrb[59].mxu1 }
 0x76a   :  { %1405 = vst [vmem:[%s2276_s8 + $0x40] sm:$0xff] %v1367_v55  ;;  %v1370_v59 = vadd.f32 %v1503_v36, %v1369_v58 }
 0x76b   :  { %1408 = vst [vmem:[%s2276_s8 + $0x58] sm:$0xff] %v1378_v57 }
 0x76c   :  { %1406 = vst [vmem:[%s2276_s8 + $0x48] sm:$0xff] %v1370_v59 }
 0x76e   :  { %v1894_v60 = vpop.f32.mrb[60].mxu1 }
 0x76f   :  { %v1391_v61 = vadd.f32 %v1894_v60, %v1503_v36  ;;  %v1382_v62 = vpop.f32.mrb[61].mxu1 }
 0x770   :  { %v1383_v63 = vadd.f32 %v1503_v36, %v1382_v62  ;;  %v1895_v0 = vpop.f32.mrb[62].mxu1 }
 0x771   :  { %1411 = vst [vmem:[%s2276_s8 + $0x70] sm:$0xff] %v1391_v61  ;;  %v1394_v8 = vadd.f32 %v1895_v0, %v1503_v36  ;;  %v1385_v9 = vpop.f32.mrb[63].mxu1 }
 0x772   :  { %1409 = vst [vmem:[%s2276_s8 + $0x60] sm:$0xff] %v1383_v63  ;;  %v1386_v10 = vadd.f32 %v1503_v36, %v1385_v9 }
 0x773   :  { %1412 = vst [vmem:[%s2276_s8 + $0x78] sm:$0xff] %v1394_v8 }
 0x774   :  { %1410 = vst [vmem:[%s2276_s8 + $0x68] sm:$0xff] %v1386_v10 }

</bundles_post_ra>
